<compile_context>
chip_gen: v5e
topology: v5e:2x2
jax: 0.10.0
libtpu: 0.0.40
codegen_flags: <defaults>
</compile_context>

<pallas_src>
import numpy as np
import jax
import jax.numpy as jnp
from jax.experimental import pallas as pl
from jax.experimental.pallas import tpu as pltpu

_TARGET_X_BYTES = 2 * 1024 * 1024     # ~2 MiB of x per grid step (85%+ of HBM roofline)
_VMEM_TILE_BUDGET = 16 * 1024 * 1024  # combined double-buffer budget used for tile sizing
_VMEM_LIMIT_BYTES = 32 * 1024 * 1024  # explicit scoped-VMEM limit; safe on v5e/v6e/v7x


def make_pe_table(d_model: int, max_len: int = 5000) -> jnp.ndarray:
    """Replicates the torch buffer construction. Returns (max_len, d_model) float32."""
    position = np.arange(0, max_len, dtype=np.float32)[:, None]            # (max_len, 1)
    div_term = np.exp(np.arange(0, d_model, 2, dtype=np.float32)
                      * (-np.log(10000.0) / d_model))                      # (d_model/2,)
    pe = np.zeros((max_len, d_model), dtype=np.float32)
    pe[:, 0::2] = np.sin(position * div_term)
    pe[:, 1::2] = np.cos(position * div_term)
    return jnp.asarray(pe)


def _pe_add_kernel_3d(x_ref, pe_ref, o_ref):
    # x_ref/o_ref: (tB, tS, D); pe_ref: (tS, D) broadcast over the batch-tile axis.
    # Compute in f32 (safe on v5e's VPU); cast only on the lane-dense store.
    x = x_ref[...].astype(jnp.float32)
    pe = pe_ref[...].astype(jnp.float32)
    o_ref[...] = (x + pe[None, :, :]).astype(o_ref.dtype)


def _pe_add_kernel_2d(x_ref, pe_ref, o_ref):
    # x_ref/o_ref: (B, tC); pe_ref: (1, tC) broadcast over rows.
    x = x_ref[...].astype(jnp.float32)
    pe = pe_ref[...].astype(jnp.float32)
    o_ref[...] = (x + pe).astype(o_ref.dtype)


def positional_encoding_forward(x: jnp.ndarray, pe_table: jnp.ndarray) -> jnp.ndarray:
    """Eval-mode forward: x + pe[:S] broadcast over batch.

    x: (B, S, D); pe_table: (max_len, D) float32.  Output dtype == x.dtype.
    (Note: PyTorch would type-promote bf16 x + f32 pe to f32; we keep x.dtype.)
    """
    B, S, D = x.shape
    itemsize = x.dtype.itemsize
    # Pre-cast pe to x.dtype once: halves pe HBM traffic and its VMEM buffers for bf16.
    pe_slice = pe_table[:S, :].astype(x.dtype)

    cost = pl.CostEstimate(
        flops=B * S * D,
        transcendentals=0,
        bytes_accessed=2 * B * S * D * itemsize + S * D * itemsize,
    )

    if D % 128 == 0:
        # ---- Path A: lane-aligned d_model.  Tile S (and B when the slab is small).
        sub = max(8, 32 // itemsize)            # native sublane pack: 8 f32, 16 bf16, 32 i8
        row_bytes = D * itemsize
        want_rows = max(sub, _TARGET_X_BYTES // row_bytes)
        if want_rows >= S:
            tS = S                              # full-extent seq block (always legal)
        else:
            tS = max(sub, (want_rows // sub) * sub)   # cdiv grid masks the partial tail
        slab = tS * D * itemsize
        # Short sequence / small slab: tile the batch axis so each grid step moves enough
        # bytes to amortize the fixed per-step overhead.
        tB = 1
        if tS == S and slab < _TARGET_X_BYTES:
            tB = int(min(B, max(1, _TARGET_X_BYTES // max(slab, 1))))
        # Grid order (s outer, b inner) keeps pe's block index constant over the inner
        # batch loop -> one pe DMA per s-tile (matches the bytes_accessed estimate).
        grid = (pl.cdiv(S, tS), pl.cdiv(B, tB))
        return pl.pallas_call(
            _pe_add_kernel_3d,
            out_shape=jax.ShapeDtypeStruct((B, S, D), x.dtype),
            grid_spec=pltpu.PrefetchScalarGridSpec(
                num_scalar_prefetch=0,
                grid=grid,
                in_specs=[
                    pl.BlockSpec((tB, tS, D), lambda s, b: (b, s, 0)),
                    pl.BlockSpec((tS, D), lambda s, b: (s, 0)),
                ],
                out_specs=pl.BlockSpec((tB, tS, D), lambda s, b: (b, s, 0)),
            ),
            compiler_params=pltpu.CompilerParams(
                dimension_semantics=("parallel", "parallel"),
                vmem_limit_bytes=_VMEM_LIMIT_BYTES,
            ),
            input_output_aliases={0: 0},        # in-place add: no second HBM buffer
            cost_estimate=cost,
        )(x, pe_slice)

    # ---- Path B: d_model not a multiple of 128 (e.g. D=32).  Flatten (S, D) into one
    # lane axis so stores are unmasked / lane-dense, tiling the lane axis in multiples
    # of 128 with a cdiv grid (masked tail) so no full-extent giant block is needed.
    SD = S * D
    x2 = x.reshape(B, SD)
    pe2 = pe_slice.reshape(1, SD)
    rows_pad = max(8, ((B + 7) // 8) * 8)       # VMEM pads the sublane dim to 8
    per_col_bytes = 4 * rows_pad * itemsize + 2 * 8 * itemsize   # 2*x + 2*out + 2*pe bufs
    max_cols = max(128, (_VMEM_TILE_BUDGET // per_col_bytes) // 128 * 128)
    if SD >= 128:
        tC = int(min((SD // 128) * 128, max_cols))   # multiple of 128; tail is masked
    else:
        tC = SD                                      # full-extent lane block (legal)
    grid = (pl.cdiv(SD, tC),)
    out2 = pl.pallas_call(
        _pe_add_kernel_2d,
        out_shape=jax.ShapeDtypeStruct((B, SD), x.dtype),
        grid_spec=pltpu.PrefetchScalarGridSpec(
            num_scalar_prefetch=0,
            grid=grid,
            in_specs=[
                pl.BlockSpec((B, tC), lambda c: (0, c)),
                pl.BlockSpec((1, tC), lambda c: (0, c)),
            ],
            out_specs=pl.BlockSpec((B, tC), lambda c: (0, c)),
        ),
        compiler_params=pltpu.CompilerParams(
            dimension_semantics=("parallel",),
            vmem_limit_bytes=_VMEM_LIMIT_BYTES,
        ),
        input_output_aliases={0: 0},
        cost_estimate=cost,
    )(x2, pe2)
    return out2.reshape(B, S, D)


if __name__ == "__main__":
    key = jax.random.PRNGKey(0)
    k1, k2, k3 = jax.random.split(key, 3)
    max_len = 64

    # Case 1: small d_model (D=32) -> lane-dense flattened path (Path B).
    B, S, D = 2, 8, 32
    x = jax.random.normal(k1, (B, S, D), dtype=jnp.float32)
    pe_table = make_pe_table(D, max_len)
    ref = x + pe_table[:S, :][None, :, :]                 # eval-mode dropout == identity
    out = jax.block_until_ready(positional_encoding_forward(x, pe_table))
    np.testing.assert_allclose(np.asarray(out), np.asarray(ref), rtol=1e-6, atol=1e-6)

    # Case 2: lane-aligned d_model (D=128), f32 -> Path A with batch tiling (tB > 1).
    B2, S2, D2 = 2, 16, 128
    x2 = jax.random.normal(k2, (B2, S2, D2), dtype=jnp.float32)
    pe_table2 = make_pe_table(D2, max_len)
    ref2 = x2 + pe_table2[:S2, :][None, :, :]
    out2 = jax.block_until_ready(positional_encoding_forward(x2, pe_table2))
    np.testing.assert_allclose(np.asarray(out2), np.asarray(ref2), rtol=1e-6, atol=1e-6)

    # Case 3: bf16 input, S not a multiple of 8 -> relaxed Path A gate, full-extent S
    # block, pe loaded in bf16 (halved pe traffic), add done in f32.
    B3, S3, D3 = 2, 12, 128
    x3 = jax.random.normal(k3, (B3, S3, D3), dtype=jnp.float32).astype(jnp.bfloat16)
    pe_table3 = make_pe_table(D3, max_len)
    pe_bf = pe_table3[:S3, :].astype(jnp.bfloat16)
    ref3 = (x3.astype(jnp.float32)
            + pe_bf.astype(jnp.float32)[None, :, :]).astype(jnp.bfloat16)
    out3 = jax.block_until_ready(positional_encoding_forward(x3, pe_table3))
    np.testing.assert_allclose(np.asarray(out3, dtype=np.float32),
                               np.asarray(ref3, dtype=np.float32),
                               rtol=2e-2, atol=2e-2)

    print("KERNEL_OK")
</pallas_src>

<mosaic_0001>
module attributes {stable_mosaic.version = 11 : i64} {
  func.func @_pe_add_kernel_2d(%arg0: i32, %arg1: memref<2x256xf32, #tpu.memory_space<vmem>>, %arg2: memref<1x256xf32, #tpu.memory_space<vmem>>, %arg3: memref<2x256xf32, #tpu.memory_space<vmem>>) attributes {dimension_semantics = [#tpu.dimension_semantics<parallel>], iteration_bounds = array<i64: 1>, scalar_prefetch = 0 : i64, scratch_operands = 0 : i64, tpu.core_type = #tpu.core_type<tc>, window_params = [{transform_indices = @transform_0, window_bounds = array<i64: 2, 256>}, {transform_indices = @transform_1, window_bounds = array<i64: 1, 256>}, {transform_indices = @transform_2, window_bounds = array<i64: 2, 256>}]} {
    %c0 = arith.constant 0 : index
    %c0_0 = arith.constant 0 : index
    %0 = vector.load %arg1[%c0, %c0_0] : memref<2x256xf32, #tpu.memory_space<vmem>>, vector<2x256xf32>
    %c0_1 = arith.constant 0 : index
    %c0_2 = arith.constant 0 : index
    %1 = vector.load %arg2[%c0_1, %c0_2] : memref<1x256xf32, #tpu.memory_space<vmem>>, vector<1x256xf32>
    %2 = vector.broadcast %1 : vector<1x256xf32> to vector<2x256xf32>
    %3 = arith.addf %0, %2 : vector<2x256xf32>
    %c0_3 = arith.constant 0 : index
    %c0_4 = arith.constant 0 : index
    %4 = vector.load %arg3[%c0_3, %c0_4] : memref<2x256xf32, #tpu.memory_space<vmem>>, vector<2x256xf32>
    tpu.vector_store %arg3[%c0_3, %c0_4], %3 {strides = array<i32>} : memref<2x256xf32, #tpu.memory_space<vmem>>, vector<2x256xf32>,
    return
  }
  func.func @transform_0(%arg0: i32) -> (i32, i32) {
    %c0_i32 = arith.constant 0 : i32
    %c0_i32_0 = arith.constant 0 : i32
    return %c0_i32, %arg0 : i32, i32
  }
  func.func @transform_1(%arg0: i32) -> (i32, i32) {
    %c0_i32 = arith.constant 0 : i32
    %c0_i32_0 = arith.constant 0 : i32
    return %c0_i32, %arg0 : i32, i32
  }
  func.func @transform_2(%arg0: i32) -> (i32, i32) {
    %c0_i32 = arith.constant 0 : i32
    %c0_i32_0 = arith.constant 0 : i32
    return %c0_i32, %arg0 : i32, i32
  }
}

</mosaic_0001>

<bundles_post_ra>
// kernel: tpu_custom_call.1
= control target key start
LH: loop header
LB: loop body
LE: loop exit
PB: predicated region body
PF: predicated region fallthrough
CT: control target
= control target key end

     0   :  { %7 = vsyncpa [#allocation3], 0  ;;  %s134_s0 = inlined_call_operand.hbm [shape: f32[2,256], index: 0, kind: input, shape index: {}, may-alias: {0,2}]   ;;  %s135_s1 = inlined_call_operand.vmem [shape: f32[1,256], index: 1, kind: input, shape index: {}]   ;;  %s136_s2 = inlined_call_operand.hbm [shape: f32[2,256], index: 2, kind: output, shape index: {}, may-alias: {0,2}]  }
   0x1   :  { %8 = vsyncpa [#allocation4], 0  ;;  %s14_s11 = sshll.u32 %s134_s0, 4  ;;  %s108_s12 = smov [#allocation2]   ;;  %s15_s11 = int_to_ptr.hbm [resolvable:$true] %s14_s11 }
   0x2   :  { %s16_s13 = sshll.u32 %s108_s12, 4  ;;  %s17_s13 = int_to_ptr.vmem [resolvable:$true] %s16_s13 }
   0x3   :  { %19 = dma.hbm_to_vmem [thread:$0]  %s15_s11, 64, %s17_s13, [#allocation3]  }
   0x4   :  { %104 = dma.done.wait [#allocation3], 64  }
   0x5   :  { %105 = vsyncadd [#allocation3], 4294967232  ;;  %v27_v0 = vld [vmem:[%s135_s1] sm:$0x3]  ;;  %vm32_vm0 = vcmask 1041408   ;;  %s109_s16 = smov [#allocation5]  }
   0x6   :  { %v29_v1 = vperm.slane %v27_v0, 0  ;;  %v30_v2 = vperm.slane %v27_v0, 1  ;;  %v26_v3 = vld [vmem:[#allocation2] sm:$0xf]  ;;  %s42_s17 = sshll.u32 %s109_s16, 4  ;;  %s44_s19 = sshll.u32 %s136_s2, 4  ;;  %s43_s17 = int_to_ptr.vmem [resolvable:$true] %s42_s17  ;;  %s45_s19 = int_to_ptr.hbm [resolvable:$true] %s44_s19 }
   0x8   :  { %v31_v4 = vrot.slane %v30_v2, 6 }
   0xa   :  { %v33_v5 = vsel %vm32_vm0, %v29_v1, %v31_v4 }
   0xb   :  { %v35_v6 = vadd.f32 %v33_v5, %v26_v3 }
   0xd   :  { %36 = vst [vmem:[#allocation5] sm:$0xf] %v35_v6 }
   0xe   :  { %47 = dma.vmem_to_hbm [thread:$0]  %s43_s17, 64, %s45_s19, [#allocation4]  }
   0xf   :  { %106 = dma.done.wait [#allocation4], 64  }
  0x10   :  { %107 = vsyncadd [#allocation4], 4294967232 }
  0x11   :  { %52 = vsyncpa [#allocation3], 1 }
  0x12   :  { %53 = vsyncpa [#allocation4], 1 }

</bundles_post_ra>
